<compile_context>
chip_gen: v7x
topology: tpu7x:2x2x1
jax: 0.10.0
libtpu: 0.0.40
codegen_flags: <defaults>
</compile_context>

<pallas_src>
import functools
import math

import jax
import jax.numpy as jnp
from jax.experimental import pallas as pl
from jax.experimental.pallas import tpu as pltpu

LN_EPS = 1e-5
_LANE = 128
_SUBLANE = 8


def _round_up(x, m):
    return ((x + m - 1) // m) * m


def _patch_embed_kernel(p_ref, w_ref, b_ref, g_ref, beta_ref, o_ref, *, e_true):
    # p_ref: (tm, Kp)  w_ref: (Kp, Ep)  b/g/beta: (1, Ep)  o_ref: (tm, Ep)
    x = jnp.dot(p_ref[...], w_ref[...], preferred_element_type=jnp.float32)
    x = x + b_ref[...].astype(jnp.float32)

    e_pad = x.shape[-1]
    inv_e = 1.0 / float(e_true)

    # Padded embed columns of x are exactly zero (zero W columns + zero bias),
    # so the full-width sum equals the sum over the true width.
    mu = jnp.sum(x, axis=-1, keepdims=True) * inv_e
    xc = x - mu
    # Padded columns of xc are exactly (-mu); remove their (Ep - E) * mu^2
    # contribution instead of masking lanes (saves an iota + where over the
    # whole tile).
    ss = jnp.sum(xc * xc, axis=-1, keepdims=True)
    if e_pad != e_true:
        ss = ss - float(e_pad - e_true) * (mu * mu)
    var = ss * inv_e

    # Fold gamma into the normalization scale; padded gamma/beta are zero, so
    # padded output columns are exactly zero.
    scale = jax.lax.rsqrt(var + LN_EPS) * g_ref[...].astype(jnp.float32)
    y = xc * scale + beta_ref[...].astype(jnp.float32)
    o_ref[...] = y.astype(o_ref.dtype)


def patch_embed_pallas(patches, w, b, gamma, beta, *, matmul_dtype=None,
                       vmem_budget_bytes=24 * 1024 * 1024):
    """patches: (M, K), w: (K, E), b/gamma/beta: (E,) -> (M, E)."""
    M, K = patches.shape
    Kw, E = w.shape
    assert Kw == K
    out_dtype = patches.dtype

    # Optional reduced-precision matmul inputs (v6e/v7x native bf16 MXU path);
    # accumulation and LayerNorm stay in f32 inside the kernel.
    if matmul_dtype is not None:
        patches = patches.astype(matmul_dtype)
        w = w.astype(matmul_dtype)

    # Lane-dense zero-padding of K (contraction) and E (output lanes) to 128.
    # Zero weight rows/columns and zero bias/gamma/beta keep the math exact.
    Kp = _round_up(K, _LANE)
    Ep = _round_up(E, _LANE)
    if Kp != K:
        patches = jnp.pad(patches, ((0, 0), (0, Kp - K)))
        w = jnp.pad(w, ((0, Kp - K), (0, 0)))
    if Ep != E:
        w = jnp.pad(w, ((0, 0), (0, Ep - E)))
        b = jnp.pad(b, (0, Ep - E))
        gamma = jnp.pad(gamma, (0, Ep - E))
        beta = jnp.pad(beta, (0, Ep - E))

    in_bytes = jnp.dtype(patches.dtype).itemsize
    out_bytes = jnp.dtype(out_dtype).itemsize

    # Row tile: largest that fits the double-buffered in/out tiles inside the
    # VMEM budget, capped at 512; if one tile would swallow all rows, halve so
    # the parallel grid has >= 2 steps (v7x megacore sharding).
    per_row = 2 * Kp * in_bytes + 2 * Ep * out_bytes
    tm = max(_SUBLANE,
             min(512, (vmem_budget_bytes // per_row) // _SUBLANE * _SUBLANE))
    if tm >= M:
        tm = max(_SUBLANE, _round_up(pl.cdiv(M, 2), _SUBLANE))

    Mp = _round_up(M, tm)
    if Mp != M:
        # Padded rows stay finite (constant row -> var=0 -> rsqrt(eps)) and are
        # sliced off below.
        patches = jnp.pad(patches, ((0, Mp - M), (0, 0)))

    b2 = b.reshape(1, Ep)
    g2 = gamma.reshape(1, Ep)
    beta2 = beta.reshape(1, Ep)

    cost = pl.CostEstimate(
        flops=2 * M * K * E,
        transcendentals=M,  # one rsqrt per patch row
        bytes_accessed=(M * Kp * in_bytes + Kp * Ep * in_bytes
                        + M * Ep * out_bytes + 3 * Ep * 4),
    )

    out = pl.pallas_call(
        functools.partial(_patch_embed_kernel, e_true=E),
        out_shape=jax.ShapeDtypeStruct((Mp, Ep), out_dtype),
        grid_spec=pltpu.PrefetchScalarGridSpec(
            num_scalar_prefetch=0,
            grid=(Mp // tm,),
            in_specs=[
                pl.BlockSpec((tm, Kp), lambda i: (i, 0)),
                pl.BlockSpec((Kp, Ep), lambda i: (0, 0)),
                pl.BlockSpec((1, Ep), lambda i: (0, 0)),
                pl.BlockSpec((1, Ep), lambda i: (0, 0)),
                pl.BlockSpec((1, Ep), lambda i: (0, 0)),
            ],
            out_specs=pl.BlockSpec((tm, Ep), lambda i: (i, 0)),
        ),
        compiler_params=pltpu.CompilerParams(
            dimension_semantics=("parallel",),
            vmem_limit_bytes=48 * 1024 * 1024,
        ),
        cost_estimate=cost,
    )(patches, w, b2, g2, beta2)

    return out[:M, :E]


def nchw_to_patches(x, patch_size):
    """x: (B, C, H, W) -> (B*num_patches, C*P*P), patch vec ordered (c, ph, pw)."""
    # TODO(synk): fold this unfold into the kernel via a BlockSpec over
    # (B, gh, gw) reading NCHW slabs directly, to avoid materializing the
    # (M, K) patch matrix in HBM.
    B, C, H, W = x.shape
    P = patch_size
    gh, gw = H // P, W // P
    x = x.reshape(B, C, gh, P, gw, P)
    # -> (B, gh, gw, C, P, P): row-major (gh, gw) patch order == Conv2d flatten.
    x = jnp.transpose(x, (0, 2, 4, 1, 3, 5))
    return x.reshape(B * gh * gw, C * P * P)


class PixelEmbeddingPallas:
    """JAX/Pallas port of PixelEmbedding (ViTPatchEmbeddings + LayerNorm)."""

    def __init__(self, image_size=16, patch_size=4, num_channels=4, embed_dim=32,
                 key=jax.random.PRNGKey(0), matmul_dtype=None):
        self.image_size = (image_size, image_size)
        self.patch_size = (patch_size, patch_size)
        self.num_channels = num_channels
        self.embed_dim = embed_dim
        self.num_patches = (image_size // patch_size) * (image_size // patch_size)
        self.matmul_dtype = matmul_dtype  # e.g. jnp.bfloat16 on v6e/v7x

        K = num_channels * patch_size * patch_size
        kw, kb = jax.random.split(key)

        # Xavier-uniform on the flattened (E, K) view (as in init_weight()).
        bound_w = math.sqrt(6.0 / (K + embed_dim))
        w_flat = jax.random.uniform(kw, (embed_dim, K), jnp.float32,
                                    minval=-bound_w, maxval=bound_w)
        self.proj_w = jnp.transpose(w_flat)  # (K, E)

        # Conv2d default bias init: U(-1/sqrt(fan_in), 1/sqrt(fan_in)).
        bound_b = 1.0 / math.sqrt(K)
        self.proj_b = jax.random.uniform(kb, (embed_dim,), jnp.float32,
                                         minval=-bound_b, maxval=bound_b)

        # LayerNorm affine params (default init: ones / zeros).
        self.ln_gamma = jnp.ones((embed_dim,), jnp.float32)
        self.ln_beta = jnp.zeros((embed_dim,), jnp.float32)

    def __call__(self, pixel_values):
        B, C, H, W = pixel_values.shape
        if C != self.num_channels:
            raise ValueError(
                f"Expected {self.num_channels} channels but got {C}.")
        P = self.patch_size[0]
        patches = nchw_to_patches(pixel_values, P)          # (B*N, C*P*P)
        out = patch_embed_pallas(patches, self.proj_w, self.proj_b,
                                 self.ln_gamma, self.ln_beta,
                                 matmul_dtype=self.matmul_dtype)
        return out.reshape(B, self.num_patches, self.embed_dim)


def _reference(pixel_values, mod):
    """Pure-JAX reference for sanity checking."""
    P = mod.patch_size[0]
    patches = nchw_to_patches(pixel_values, P)
    x = patches @ mod.proj_w + mod.proj_b
    mu = jnp.mean(x, axis=-1, keepdims=True)
    var = jnp.mean((x - mu) ** 2, axis=-1, keepdims=True)
    y = (x - mu) / jnp.sqrt(var + LN_EPS)
    y = y * mod.ln_gamma + mod.ln_beta
    B = pixel_values.shape[0]
    return y.reshape(B, mod.num_patches, mod.embed_dim)


if __name__ == "__main__":
    key = jax.random.PRNGKey(0)
    k_param, k_input = jax.random.split(key)

    # Small shapes: batch=2, channels=4, image 16x16, patch 4 -> 16 patches, embed 32.
    mod = PixelEmbeddingPallas(image_size=16, patch_size=4, num_channels=4,
                               embed_dim=32, key=k_param)

    x = jax.random.normal(k_input, (2, 4, 16, 16), jnp.float32)

    out = mod(x)
    out = jax.block_until_ready(out)

    ref = _reference(x, mod)
    assert out.shape == (2, 16, 32), out.shape
    assert jnp.allclose(out, ref, atol=1e-4, rtol=1e-4), "mismatch vs reference"

    print("KERNEL_OK")
</pallas_src>

<mosaic_0001>
module attributes {stable_mosaic.version = 11 : i64} {
  func.func @_patch_embed_kernel(%arg0: i32, %arg1: memref<16x128xf32, #tpu.memory_space<vmem>>, %arg2: memref<128x128xf32, #tpu.memory_space<vmem>>, %arg3: memref<1x128xf32, #tpu.memory_space<vmem>>, %arg4: memref<1x128xf32, #tpu.memory_space<vmem>>, %arg5: memref<1x128xf32, #tpu.memory_space<vmem>>, %arg6: memref<16x128xf32, #tpu.memory_space<vmem>>) attributes {dimension_semantics = [#tpu.dimension_semantics<parallel>], iteration_bounds = array<i64: 2>, scalar_prefetch = 0 : i64, scratch_operands = 0 : i64, tpu.core_type = #tpu.core_type<tc>, window_params = [{transform_indices = @transform_0, window_bounds = array<i64: 16, 128>}, {pipeline_mode = #tpu.pipeline_mode<synchronous>, transform_indices = @transform_1, window_bounds = array<i64: 128, 128>}, {pipeline_mode = #tpu.pipeline_mode<synchronous>, transform_indices = @transform_2, window_bounds = array<i64: 1, 128>}, {pipeline_mode = #tpu.pipeline_mode<synchronous>, transform_indices = @transform_3, window_bounds = array<i64: 1, 128>}, {pipeline_mode = #tpu.pipeline_mode<synchronous>, transform_indices = @transform_4, window_bounds = array<i64: 1, 128>}, {transform_indices = @transform_5, window_bounds = array<i64: 16, 128>}]} {
    %c0 = arith.constant 0 : index
    %c0_0 = arith.constant 0 : index
    %0 = vector.load %arg1[%c0, %c0_0] : memref<16x128xf32, #tpu.memory_space<vmem>>, vector<16x128xf32>
    %c0_1 = arith.constant 0 : index
    %c0_2 = arith.constant 0 : index
    %1 = vector.load %arg2[%c0_1, %c0_2] : memref<128x128xf32, #tpu.memory_space<vmem>>, vector<128x128xf32>
    %cst = arith.constant dense<0.000000e+00> : vector<16x128xf32>
    %2 = tpu.matmul %0, %1, %cst {dimension_numbers = #tpu.dot_dimension_numbers<[1], [0], [0], [1], [0, 0, 1, 1], [], []>} : vector<16x128xf32>, vector<128x128xf32>, vector<16x128xf32> -> vector<16x128xf32>
    %c0_3 = arith.constant 0 : index
    %c0_4 = arith.constant 0 : index
    %3 = vector.load %arg3[%c0_3, %c0_4] : memref<1x128xf32, #tpu.memory_space<vmem>>, vector<1x128xf32>
    %4 = vector.broadcast %3 : vector<1x128xf32> to vector<16x128xf32>
    %5 = arith.addf %2, %4 : vector<16x128xf32>
    %cst_5 = arith.constant dense<0.000000e+00> : vector<16xf32>
    %6 = vector.multi_reduction <add>, %5, %cst_5 [1] : vector<16x128xf32> to vector<16xf32>
    %7 = vector.shape_cast %6 : vector<16xf32> to vector<16x1xf32>
    %cst_6 = arith.constant 3.125000e-02 : f32
    %8 = vector.broadcast %cst_6 : f32 to vector<16x1xf32>
    %9 = arith.mulf %7, %8 : vector<16x1xf32>
    %10 = vector.broadcast %9 : vector<16x1xf32> to vector<16x128xf32>
    %11 = arith.subf %5, %10 : vector<16x128xf32>
    %12 = arith.mulf %11, %11 : vector<16x128xf32>
    %cst_7 = arith.constant dense<0.000000e+00> : vector<16xf32>
    %13 = vector.multi_reduction <add>, %12, %cst_7 [1] : vector<16x128xf32> to vector<16xf32>
    %14 = vector.shape_cast %13 : vector<16xf32> to vector<16x1xf32>
    %15 = arith.mulf %9, %9 : vector<16x1xf32>
    %cst_8 = arith.constant 9.600000e+01 : f32
    %16 = vector.broadcast %cst_8 : f32 to vector<16x1xf32>
    %17 = arith.mulf %16, %15 : vector<16x1xf32>
    %18 = arith.subf %14, %17 : vector<16x1xf32>
    %cst_9 = arith.constant 3.125000e-02 : f32
    %19 = vector.broadcast %cst_9 : f32 to vector<16x1xf32>
    %20 = arith.mulf %18, %19 : vector<16x1xf32>
    %cst_10 = arith.constant 9.99999974E-6 : f32
    %21 = vector.broadcast %cst_10 : f32 to vector<16x1xf32>
    %22 = arith.addf %20, %21 : vector<16x1xf32>
    %23 = math.rsqrt %22 : vector<16x1xf32>
    %c0_11 = arith.constant 0 : index
    %c0_12 = arith.constant 0 : index
    %24 = vector.load %arg4[%c0_11, %c0_12] : memref<1x128xf32, #tpu.memory_space<vmem>>, vector<1x128xf32>
    %25 = vector.broadcast %23 : vector<16x1xf32> to vector<16x128xf32>
    %26 = vector.broadcast %24 : vector<1x128xf32> to vector<16x128xf32>
    %27 = arith.mulf %25, %26 : vector<16x128xf32>
    %28 = arith.mulf %11, %27 : vector<16x128xf32>
    %c0_13 = arith.constant 0 : index
    %c0_14 = arith.constant 0 : index
    %29 = vector.load %arg5[%c0_13, %c0_14] : memref<1x128xf32, #tpu.memory_space<vmem>>, vector<1x128xf32>
    %30 = vector.broadcast %29 : vector<1x128xf32> to vector<16x128xf32>
    %31 = arith.addf %28, %30 : vector<16x128xf32>
    %c0_15 = arith.constant 0 : index
    %c0_16 = arith.constant 0 : index
    %32 = vector.load %arg6[%c0_15, %c0_16] : memref<16x128xf32, #tpu.memory_space<vmem>>, vector<16x128xf32>
    tpu.vector_store %arg6[%c0_15, %c0_16], %31 {strides = array<i32>} : memref<16x128xf32, #tpu.memory_space<vmem>>, vector<16x128xf32>,
    return
  }
  func.func @transform_0(%arg0: i32) -> (i32, i32) {
    %c0_i32 = arith.constant 0 : i32
    %c0_i32_0 = arith.constant 0 : i32
    return %arg0, %c0_i32 : i32, i32
  }
  func.func @transform_1(%arg0: i32) -> (i32, i32) {
    %c0_i32 = arith.constant 0 : i32
    %c0_i32_0 = arith.constant 0 : i32
    %c0_i32_1 = arith.constant 0 : i32
    return %c0_i32, %c0_i32_0 : i32, i32
  }
  func.func @transform_2(%arg0: i32) -> (i32, i32) {
    %c0_i32 = arith.constant 0 : i32
    %c0_i32_0 = arith.constant 0 : i32
    %c0_i32_1 = arith.constant 0 : i32
    return %c0_i32, %c0_i32_0 : i32, i32
  }
  func.func @transform_3(%arg0: i32) -> (i32, i32) {
    %c0_i32 = arith.constant 0 : i32
    %c0_i32_0 = arith.constant 0 : i32
    %c0_i32_1 = arith.constant 0 : i32
    return %c0_i32, %c0_i32_0 : i32, i32
  }
  func.func @transform_4(%arg0: i32) -> (i32, i32) {
    %c0_i32 = arith.constant 0 : i32
    %c0_i32_0 = arith.constant 0 : i32
    %c0_i32_1 = arith.constant 0 : i32
    return %c0_i32, %c0_i32_0 : i32, i32
  }
  func.func @transform_5(%arg0: i32) -> (i32, i32) {
    %c0_i32 = arith.constant 0 : i32
    %c0_i32_0 = arith.constant 0 : i32
    return %arg0, %c0_i32 : i32, i32
  }
}

</mosaic_0001>

<bundles_post_ra>
// kernel: tpu_custom_call.1
= control target key start
LH: loop header
LB: loop body
LE: loop exit
PB: predicated region body
PF: predicated region fallthrough
CT: control target
= control target key end

     0   :  { %10 = vsyncpa [#allocation3], 0  ;;  %s1067_s0 = inlined_call_operand.hbm [shape: f32[32,128], index: 0, kind: input, shape index: {}]   ;;  %s1068_s1 = inlined_call_operand.hbm [shape: f32[128,128], index: 1, kind: input, shape index: {}]   ;;  %s1069_s2 = inlined_call_operand.vmem [shape: f32[1,128], index: 2, kind: input, shape index: {}]   ;;  %s1070_s3 = inlined_call_operand.vmem [shape: f32[1,128], index: 3, kind: input, shape index: {}]   ;;  %s1071_s4 = inlined_call_operand.vmem [shape: f32[1,128], index: 4, kind: input, shape index: {}]   ;;  %s1072_s5 = inlined_call_operand.hbm [shape: f32[32,128], index: 5, kind: output, shape index: {}]  }
   0x1   :  { %12 = vsyncpa [#allocation3 + $0x1], 0 }
   0x2   :  { %13 = vsyncpa [#allocation6], 0 }
   0x3   :  { %14 = vsyncpa [#allocation4], 0 }
   0x4   :  { %16 = vsyncpa [#allocation4 + $0x1], 0  ;;  %s843_s18 = smov 0   ;;  %s845_s19 = smov 0  }
   0x5   :  { %s847_s20 = smov 0   ;;  %s849_s21 = smov 0  }
   0x6 LB: > { %s864_s22 = sadd.s32 4294967295, %s804_s21   ;;  %s505_s23 = sadd.s32 4294967294, %s804_s21   ;;  %s804_s21 = sphi %s849_s21, %s1092_s21   ;;  %s800_s20 = sphi %s847_s20, %s1091_s20   ;;  %s796_s19 = sphi %s845_s19, %s1090_s19   ;;  %s792_s18 = sphi %s843_s18, %s1089_s18  }
   0x7   : > { %p42_p0 = scmp.ne.s32.totalorder %s796_s19, %s792_s18  ;;  %p1073_p1 = scmp.eq.s32.totalorder %s864_s22, 0 }
   0x8   : > { %p156_p3 = scmp.eq.s32.totalorder %s505_s23, 1  ;;  %p506_p5 = scmp.ge.s32.totalorder %s804_s21, 1 }
   0x9   : > { %p873_p4 = por %p1073_p1, %p42_p0  ;;  %p163_p7 = scmp.lt.s32.totalorder %s804_s21, 3 }
   0xa   : > { %p878_p6 = por %p156_p3, %p42_p0  ;;  %s806_s27 = smov [#allocation5]  }
   0xb   : > { %s1076_s24 = scalar_select %p873_p4, 1, 0 }
   0xc   : > { %s1077_s25 = scalar_select %p878_p6, 1, 0 }
   0xd   : > { %p883_p8 = pnand %p506_p5, %p163_p7  ;;  %s175_s28 = sshll.u32 %s806_s27, 4  ;;  %s887_s28 = int_to_ptr.vmem [resolvable:$true] %s175_s28 }
   0xe   : > { %s899_s30 = sadd.s32 1, %s804_s21   ;;  %s29_s6 = sadd.s32 1, %s800_s20 }
   0xf   : > { %s1078_s26 = scalar_select %p883_p8, 1, 0 }
  0x10   : > { %p619_p9 = pneg %p883_p8  ;;  %s26_s7 = ssub.s32 %s804_s21, %s899_s30 }
  0x11   : > { %s676_s10 = scalar_lea.hbm %s1068_s1, 2048 }
  0x12   : > { %p894_p11 = pnand %p619_p9, %p1073_p1  ;;  %p677_p12 = scmp.ne.s32.totalorder %s1068_s1, %s676_s10 }
  0x13   : > { %p683_p5 = scmp.lt.u32.totalorder %s676_s10, %s1068_s1 }
  0x14   : > { %p678_p13 = pneg %p894_p11 }
  0x16   : > { %p679_p0 = pnand %p678_p13, %p677_p12 }
  0x18   : > { %p680_p3 = pneg %p679_p0 }
  0x1a   : > { %p685_p7 = pnand %p683_p5, %p680_p3 }
  0x1c   : > { %688 = shalt.err (!%p685_p7)
}
  0x1d   : > { %s689_s15 = scalar_lea.vmem %s887_s28, 2048  ;;  %p697_p2 = scmp.lt.s32.totalorder %s887_s28, %s887_s28 }
  0x1e   : > { %p690_p9 = scmp.ne.s32.totalorder %s887_s28, %s689_s15  ;;  %p698_p6 = scmp.lt.s32.totalorder %s689_s15, %s689_s15 }
  0x20   : > { %p692_p10 = pnand %p690_p9, %p678_p13  ;;  %p699_p4 = por %p698_p6, %p697_p2 }
  0x22   : > { %p693_p1 = pneg %p692_p10 }
  0x24   : > { %p700_p8 = pnand %p699_p4, %p693_p1 }
  0x26   : > { %703 = shalt.err (!%p700_p8)
}
  0x27   : > { %s807_s16 = smov 128   ;;  %s808_s17 = smov 8  }
  0x28   : > { %622 = dma.hbm_to_vmem [thread:$0]  (!%p894_p11), %s1068_s1, 2048, %s887_s28, [#allocation6], %s807_s16, %s807_s16, %s808_s17  }
  0x29   : > { %p27_p1 = scmp.eq.s32.totalorder %s26_s7, 0  ;;  %p36_p2 = scmp.ne.s32.totalorder %s800_s20, %s796_s19 }
  0x2a   : > { %p37_p4 = scmp.eq.s32.totalorder %s804_s21, 0  ;;  %p632_p6 = scmp.lt.s32.totalorder %s804_s21, 2 }
  0x2b   : > { %s933_s8 = scalar_select %p27_p1, %s800_s20, %s29_s6  }
  0x2c   : > { %p38_p8 = por %p37_p4, %p36_p2  ;;  %p1080_p10 = scmp.eq.s32.totalorder %s864_s22, 1 }
  0x2d   : > { %s198_s29 = sand.u32 1, %s800_s20   ;;  %s524_s10 = sshll.u32 %s804_s21, 8 }
  0x2e   : > { %p937_p12 = por %p1080_p10, %p36_p2  ;;  %s509_s11 = sshll.u32 %s198_s29, 4 }
  0x2f   : > { %s946_s14 = scalar_lea.hbm %s1067_s0, %s524_s10  ;;  %s202_s28 = scalar_lea.vmem [#allocation2], %s509_s11 }
  0x30   : > { %s209_s6 = sshll.u32 %s202_s28, 4  ;;  %p948_p11 = pnand %p632_p6, %p38_p8  ;;  %s952_s6 = int_to_ptr.vmem [resolvable:$true] %s209_s6 }
  0x31   : > { %s954_s15 = scalar_lea.sflag [#allocation3], %s198_s29  ;;  %s704_s23 = scalar_lea.hbm %s946_s14, 256 }
  0x32   : > { %p705_p13 = scmp.ne.s32.totalorder %s946_s14, %s704_s23  ;;  %p706_p0 = pneg %p948_p11 }
  0x33   : > { %s709_s11 = scalar_lea.hbm %s1067_s0, 512  ;;  %p710_p7 = scmp.lt.u32.totalorder %s946_s14, %s1067_s0 }
  0x34   : > { %p707_p3 = pnand %p706_p0, %p705_p13  ;;  %p711_p9 = scmp.lt.u32.totalorder %s709_s11, %s704_s23 }
  0x35   : > { %p713_p2 = scmp.lt.u32.totalorder %s704_s23, %s946_s14 }
  0x36   : > { %p708_p5 = pneg %p707_p3  ;;  %p712_p1 = por %p711_p9, %p710_p7 }
  0x38   : > { %p714_p4 = por %p713_p2, %p712_p1 }
  0x3a   : > { %p715_p6 = pnand %p714_p4, %p708_p5 }
  0x3c   : > { %718 = shalt.err (!%p715_p6)
}
  0x3d   : > { %s719_s29 = scalar_lea.vmem %s952_s6, 256  ;;  %s809_s28 = smov [#allocation2]  }
  0x3e   : > { %p720_p8 = scmp.ne.s32.totalorder %s952_s6, %s719_s29  ;;  %s724_s27 = sshll.u32 %s809_s28, 4  ;;  %s725_s27 = int_to_ptr.vmem [resolvable:$false] %s724_s27 }
  0x3f   : > { %s726_s10 = scalar_lea.vmem %s725_s27, 512  ;;  %p727_p3 = scmp.lt.s32.totalorder %s952_s6, %s725_s27 }
  0x40   : > { %p722_p10 = pnand %p720_p8, %p706_p0  ;;  %p728_p7 = scmp.lt.s32.totalorder %s726_s10, %s719_s29 }
  0x42   : > { %p723_p13 = pneg %p722_p10  ;;  %p729_p9 = por %p728_p7, %p727_p3 }
  0x44   : > { %p730_p1 = pnand %p729_p9, %p723_p13 }
  0x46   : > { %733 = shalt.err (!%p730_p1)
}
  0x47   : > { %626 = dma.hbm_to_vmem [thread:$0]  (!%p948_p11), %s946_s14, 256, %s952_s6, %s954_s15, %s807_s16, %s807_s16, %s808_s17  }
  0x48   : > { %p1083_p0 = scmp.ne.s32.totalorder %s1078_s26, 0 }
  0x49   : > { %s988_s23 = sand.u32 (!%p1083_p0), 1, %s796_s19   ;;  %p1084_p5 = scmp.ne.s32.totalorder (!%p1083_p0), %s1076_s24, 0 }
  0x4a   : > { %221 = sbr.rel (%p1083_p0) target bundleno = 667 (0x29b), region = 40  ;;  %s513_s11 = sshll.u32 (!%p1083_p0), %s988_s23, 4 }
  0x4b   : > { %s224_s12 = scalar_lea.sflag (!%p1083_p0), [#allocation3], %s988_s23  ;;  %s994_s7 = scalar_lea.vmem (!%p1083_p0), [#allocation2], %s513_s11 }
  0x51   : > { %779 = dma.done.wait (%p1084_p5), %s224_s12, 256  }
  0x52   : > { %781 = vsyncadd (%p1084_p5), %s224_s12, 4294967040  ;;  %p1085_p11 = scmp.eq.s32.totalorder %s864_s22, 0 }
  0x54   : > { %783 = dma.done.wait (%p1085_p11), [#allocation6], 2048   ;;  %p1086_p2 = pmov %p1085_p11 }
  0x55   : > { %v262_v0 = vld [vmem:[#allocation5] sm:$0xff]  ;;  %v263_v1 = vld [vmem:[#allocation5 + $0x8] sm:$0xff]  ;;  %v264_v2 = vld [vmem:[#allocation5 + $0x10] sm:$0xff]  ;;  %s525_s15 = sshll.u32 %s864_s22, 8  ;;  %s257_s13 = scalar_lea.vmem [#allocation7], %s513_s11 }
  0x56   : > { %785 = vsyncadd (%p1086_p2), [#allocation6], 4294965248  ;;  %v579_v3 = vpack.c.bf16 %v263_v1, %v262_v0  ;;  %v265_v4 = vld [vmem:[#allocation5 + $0x18] sm:$0xff]  ;;  %v266_v6 = vld [vmem:[#allocation5 + $0x20] sm:$0xff]  ;;  %s422_s29 = sshll.u32 %s257_s13, 4  ;;  %s1021_s10 = scalar_lea.hbm %s1072_s5, %s525_s15  ;;  %s1023_s29 = int_to_ptr.vmem [resolvable:$true] %s422_s29 }
  0x57   : > { %v583_v5 = vpack.c.bf16 %v265_v4, %v264_v2  ;;  %v267_v7 = vld [vmem:[#allocation5 + $0x28] sm:$0xff]  ;;  %v260_v9 = vld [vmem:[%s994_s7] sm:$0xff]  ;;  %v269_v11 = vld [vmem:[#allocation5 + $0x38] sm:$0xff]  ;;  %s409_s12 = scalar_lea.sflag [#allocation4], %s988_s23  ;;  %s810_s22 = smov [#allocation7]  }
  0x58   : > { %580 = vmatprep.subr.bf16.mxu0 %v579_v3  ;;  %v587_v8 = vpack.c.bf16 %v267_v7, %v266_v6  ;;  %v268_v10 = vld [vmem:[#allocation5 + $0x30] sm:$0xff]  ;;  %576 = vmatprep.mubr.f32.mxu0 %v260_v9  ;;  %v270_v13 = vld [vmem:[#allocation5 + $0x40] sm:$0xff]  ;;  %v271_v14 = vld [vmem:[#allocation5 + $0x48] sm:$0xff]  ;;  %s738_s11 = sshll.u32 %s810_s22, 4  ;;  %s739_s11 = int_to_ptr.vmem [resolvable:$false] %s738_s11 }
  0x59   : > { %582 = vmatpush3.bf16.msra.mxu0 %v579_v3  ;;  %v591_v12 = vpack.c.bf16 %v269_v11, %v268_v10  ;;  %v595_v15 = vpack.c.bf16 %v271_v14, %v270_v13  ;;  %v272_v16 = vld [vmem:[#allocation5 + $0x50] sm:$0xff]  ;;  %v273_v17 = vld [vmem:[#allocation5 + $0x58] sm:$0xff]  ;;  %v274_v19 = vld [vmem:[#allocation5 + $0x60] sm:$0xff]  ;;  %s740_s24 = scalar_lea.vmem %s739_s11, 512  ;;  %p741_p10 = scmp.lt.s32.totalorder %s1023_s29, %s739_s11 }
  0x5a   : > { %584 = vmatprep.subr.bf16.mxu0 %v583_v5  ;;  %v599_v18 = vpack.c.bf16 %v273_v17, %v272_v16  ;;  %v275_v20 = vld [vmem:[#allocation5 + $0x68] sm:$0xff]  ;;  %v276_v22 = vld [vmem:[#allocation5 + $0x70] sm:$0xff]  ;;  %v277_v23 = vld [vmem:[#allocation5 + $0x78] sm:$0xff] }
  0x5b   : > { %v603_v21 = vpack.c.bf16 %v275_v20, %v274_v19  ;;  %v607_v24 = vpack.c.bf16 %v277_v23, %v276_v22  ;;  %v261_v25 = vld [vmem:[%s994_s7 + $0x8] sm:$0xff]  ;;  %v516_v26 = vld [vmem:[%s1069_s2] ss:$0 sm:$0xff]  ;;  %s734_s7 = scalar_lea.vmem %s1023_s29, 256 }
  0x5c   : > { %v517_v51 = vld [vmem:[%s1070_s3] ss:$0 sm:$0xff]  ;;  %p735_p4 = scmp.ne.s32.totalorder %s1023_s29, %s734_s7  ;;  %p742_p13 = scmp.lt.s32.totalorder %s740_s24, %s734_s7 }
  0x5d   : > { %586 = vmatpush3.bf16.msra.mxu0 %v583_v5  ;;  %v518_v54 = vld [vmem:[%s1071_s4] ss:$0 sm:$0xff] }
  0x5e   : > { %588 = vmatprep.subr.bf16.mxu0 %v587_v8  ;;  %p736_p6 = pnand %p735_p4, %p937_p12  ;;  %p743_p3 = por %p742_p13, %p741_p10 }
  0x60   : > { %p737_p8 = pneg %p736_p6 }
  0x61   : > { %590 = vmatpush3.bf16.msra.mxu0 %v587_v8 }
  0x62   : > { %592 = vmatprep.subr.bf16.mxu0 %v591_v12  ;;  %p744_p7 = pnand %p743_p3, %p737_p8 }
  0x65   : > { %594 = vmatpush3.bf16.msra.mxu0 %v591_v12 }
  0x66   : > { %596 = vmatprep.subr.bf16.mxu0 %v595_v15 }
  0x69   : > { %598 = vmatpush3.bf16.msra.mxu0 %v595_v15 }
  0x6a   : > { %600 = vmatprep.subr.bf16.mxu0 %v599_v18 }
  0x6d   : > { %602 = vmatpush3.bf16.msra.mxu0 %v599_v18 }
  0x6e   : > { %604 = vmatprep.subr.bf16.mxu0 %v603_v21 }
  0x71   : > { %606 = vmatpush3.bf16.msra.mxu0 %v603_v21 }
  0x72   : > { %608 = vmatprep.subr.bf16.mxu0 %v607_v24 }
  0x75   : > { %610 = vmatpush3.bf16.msra.mxu0 %v607_v24 }
  0x78   : > { %577 = vmatmul.mubr.f32.vlgmr.msra.gmra.mrb[0].mxu0 %v261_v25 }
 0x14b   : > { %v578_v27 = vpop.f32.mrb[0].mxu0 }
 0x14c   : > { %v351_v28 = vpop.f32.mrb[1].mxu0  ;;  %v357_v30 = vadd.f32 %v578_v27, %v516_v26 }
 0x14d   : > { %v352_v29 = vadd.f32 %v516_v26, %v351_v28 }
 0x14f   : > { %360 = vadd.xlane.f32.xlu0 %v352_v29 }
 0x153   : > { %362 = vadd.xlane.f32.xlu0 %v357_v30 }
 0x1dc   : > { %v361_v31 = vpop.xlane.xlu0 %360 }
 0x1dd   : > { %v364_v32 = vmul.f32 0.03125, %v361_v31 }
 0x1df   : > { %v366_v33 = vsub.f32 %v352_v29, %v364_v32  ;;  %v374_v39 = vmul.f32 %v364_v32, %v364_v32 }
 0x1e0   : > { %v363_v34 = vpop.xlane.xlu0 %362 }
 0x1e1   : > { %v365_v35 = vmul.f32 0.03125, %v363_v34  ;;  %v368_v36 = vmul.f32 %v366_v33, %v366_v33  ;;  %v376_v41 = vmul.f32 96.0, %v374_v39 }
 0x1e3   : > { %v367_v37 = vsub.f32 %v357_v30, %v365_v35  ;;  %370 = vadd.xlane.f32.xlu1 %v368_v36  ;;  %v375_v40 = vmul.f32 %v365_v35, %v365_v35 }
 0x1e5   : > { %v369_v38 = vmul.f32 %v367_v37, %v367_v37  ;;  %v377_v44 = vmul.f32 96.0, %v375_v40 }
 0x1e7   : > { %372 = vadd.xlane.f32.xlu1 %v369_v38 }
 0x270   : > { %v371_v42 = vpop.xlane.xlu1 %370 }
 0x271   : > { %v378_v43 = vsub.f32 %v371_v42, %v376_v41 }
 0x273   : > { %v380_v45 = vmul.f32 0.03125, %v378_v43 }
 0x274   : > { %v373_v46 = vpop.xlane.xlu1 %372 }
 0x275   : > { %v382_v47 = vadd.f32 1e-05, %v380_v45  ;;  %v379_v48 = vsub.f32 %v373_v46, %v377_v44 }
 0x277   : > { %672 = vrsqrt.f32 %v382_v47  ;;  %v381_v49 = vmul.f32 0.03125, %v379_v48 }
 0x279   : > { %v383_v50 = vadd.f32 1e-05, %v381_v49 }
 0x27b   : > { %674 = vrsqrt.f32 %v383_v50 }
 0x281   : > { %v673_v52 = vpop.eup %672 }
 0x282   : > { %v393_v53 = vmul.f32 %v673_v52, %v517_v51 }
 0x284   : > { %v395_v55 = vmul.f32 %v393_v53, %v366_v33 }
 0x285   : > { %v675_v56 = vpop.eup %674 }
 0x286   : > { %v404_v57 = vadd.f32 %v518_v54, %v395_v55  ;;  %v394_v58 = vmul.f32 %v675_v56, %v517_v51 }
 0x288   : > { %v396_v59 = vmul.f32 %v394_v58, %v367_v37  ;;  %406 = vst [vmem:[%s257_s13] sm:$0xff] %v404_v57 }
 0x28a   : > { %v405_v60 = vadd.f32 %v518_v54, %v396_v59 }
 0x28c   : > { %407 = vst [vmem:[%s257_s13 + $0x8] sm:$0xff] %v405_v60 }
 0x28d   : > { %747 = shalt.err (!%p744_p7)
}
 0x28e   : > { %s748_s26 = scalar_lea.hbm %s1021_s10, 256  ;;  %s752_s14 = scalar_lea.hbm %s1072_s5, 512 }
 0x28f   : > { %p749_p9 = scmp.ne.s32.totalorder %s1021_s10, %s748_s26  ;;  %p753_p5 = scmp.lt.u32.totalorder %s1021_s10, %s1072_s5 }
 0x290   : > { %p754_p11 = scmp.lt.u32.totalorder %s752_s14, %s748_s26  ;;  %p756_p4 = scmp.lt.u32.totalorder %s748_s26, %s1021_s10 }
 0x291   : > { %p750_p1 = pnand %p749_p9, %p937_p12 }
 0x292   : > { %p755_p2 = por %p754_p11, %p753_p5 }
 0x293   : > { %p751_p0 = pneg %p750_p1 }
 0x294   : > { %p757_p6 = por %p756_p4, %p755_p2 }
 0x296   : > { %p758_p8 = pnand %p757_p6, %p751_p0 }
 0x298   : > { %761 = shalt.err (!%p758_p8)
}
 0x299   : > { %s811_s13 = smov 128   ;;  %s812_s28 = smov 8  }
 0x29a   : > { %617 = dma.vmem_to_hbm [thread:$0]  (%p937_p12), %s1023_s29, 256, %s1021_s10, %s409_s12, %s811_s13, %s811_s13, %s812_s28  }
 0x29b PF: > { %s437_s27 = sand.u32 1, %s792_s18   ;;  %p1087_p10 = scmp.ne.s32.totalorder %s1077_s25, 0 }
 0x29c   : > { %p1088_p13 = scmp.ge.s32.totalorder %s804_s21, 2  ;;  %s438_s7 = scalar_lea.sflag [#allocation4], %s437_s27 }
 0x29e   : > { %p628_p3 = pnand %p1088_p13, %p1087_p10 }
 0x2a0   : > { %787 = dma.done.wait (!%p628_p3), %s438_s7, 256  }
 0x2a1   : > { %789 = vsyncadd (!%p628_p3), %s438_s7, 4294967040  ;;  %p19_p7 = scmp.ge.s32.totalorder %s899_s30, 4   ;;  %s1089_s18 = smov %s796_s19 }
 0x2a2   : > { %s1090_s19 = smov %s800_s20  ;;  %s1091_s20 = smov %s933_s8 }
 0x2a3   : > { %s1092_s21 = smov %s899_s30  ;;  %21 = sbr.rel (!%p19_p7) target bundleno = 6 (0x6), region = 89 }
 0x2aa   :  { %443 = vsyncpa [#allocation3], 1 }
 0x2ab   :  { %445 = vsyncpa [#allocation3 + $0x1], 1 }
 0x2ac   :  { %446 = vsyncpa [#allocation6], 1 }
 0x2ad   :  { %447 = vsyncpa [#allocation4], 1 }
 0x2ae   :  { %449 = vsyncpa [#allocation4 + $0x1], 1 }

</bundles_post_ra>
